<compile_context>
chip_gen: v5e
topology: v5e:2x2
jax: 0.10.0
libtpu: 0.0.40
codegen_flags: <defaults>
</compile_context>

<pallas_src>
import jax
import jax.numpy as jnp
from jax.experimental import pallas as pl
from jax.experimental.pallas import tpu as pltpu

MARGIN = 1.7
_EPS = 1e-6  # matches torch.nn.functional.pairwise_distance default eps


def _sublane_multiple(itemsize: int) -> int:
    # minimal second-to-last tile multiple per dtype width
    return {4: 8, 2: 16, 1: 32}.get(itemsize, 8)


def _pick_block_rows(B: int, D: int, emb_itemsize: int, lbl_itemsize: int) -> int:
    """Rows per tile, capped by a VMEM byte budget (not a row count).

    Budget covers 2 inputs x 2 pipeline buffers of the native-dtype (TB, D)
    blocks plus ~3x TB*D*4 bytes of f32 temporaries materialized in-kernel
    after the widen (e1_f32 / e2_f32 / diff / diff*diff, partially reused).
    24 MiB total stays under the 32 MiB scoped limit and is safe on v7x
    (64 MiB physical VMEM); tiles come out at ~2-4 MiB per buffer, amortizing
    the ~0.35 us per-grid-step overhead to <10% even at v7x HBM bandwidth.
    """
    sub = max(_sublane_multiple(emb_itemsize), _sublane_multiple(lbl_itemsize))
    budget = 24 << 20
    bytes_per_row = max(D * (4 * emb_itemsize + 12), 1)
    tb = max(sub, budget // bytes_per_row)
    tb = (tb // sub) * sub
    b_pad = -(-B // sub) * sub          # round B up to the sublane multiple
    return max(sub, min(tb, b_pad))


def _make_kernel(B: int, TB: int, margin: float, eps: float):
    ragged = (B % TB) != 0

    def kernel(e1_ref, e2_ref, lbl_ref, out_ref):
        # Widen narrow dtypes in-register; HBM traffic stays at the input width.
        e1 = e1_ref[...].astype(jnp.float32)                  # (TB, D)
        e2 = e2_ref[...].astype(jnp.float32)                  # (TB, D)
        lbl = lbl_ref[...].astype(jnp.float32)                # (TB, 1)

        diff = e1 - e2 + eps                                  # (TB, D)
        d2 = jnp.sum(diff * diff, axis=-1, keepdims=True)     # (TB, 1) squared distance
        d = jnp.sqrt(d2)                                      # only the hinge term needs d
        hinge = jnp.maximum(margin - d, 0.0)                  # relu(margin - d)

        # 0.5*(lbl*1.0*d^2 + (1-lbl)*2.0*hinge^2); the 0.5 and 1/B are applied in the wrapper.
        per_row = lbl * d2 + 2.0 * (1.0 - lbl) * (hinge * hinge)

        def write(total):
            out_ref[...] = jnp.full(out_ref.shape, total, jnp.float32)

        if ragged:
            pid = pl.program_id(0)
            last = pl.num_programs(0) - 1

            @pl.when(pid == last)
            def _masked():
                rows = pid * TB + jax.lax.broadcasted_iota(jnp.int32, (TB, 1), 0)
                write(jnp.sum(jnp.where(rows < B, per_row, 0.0)))

            @pl.when(pid != last)
            def _unmasked():
                write(jnp.sum(per_row))
        else:
            write(jnp.sum(per_row))

    return kernel


def contrastive_loss(emb1: jax.Array, emb2: jax.Array, label: jax.Array) -> jax.Array:
    """emb1, emb2: (B, D); label: (B,) of {0., 1.}. Returns scalar mean loss (f32)."""
    B, D = emb1.shape
    assert emb2.shape == (B, D), (emb1.shape, emb2.shape)

    lbl2d = label.reshape(B, 1)
    if not jnp.issubdtype(lbl2d.dtype, jnp.floating):
        lbl2d = lbl2d.astype(jnp.float32)   # bool/int labels -> float once in the wrapper

    emb_itemsize = jnp.dtype(emb1.dtype).itemsize
    lbl_itemsize = jnp.dtype(lbl2d.dtype).itemsize
    TB = _pick_block_rows(B, D, emb_itemsize, lbl_itemsize)
    num_tiles = pl.cdiv(B, TB)

    kernel = _make_kernel(B, TB, MARGIN, _EPS)

    # Each grid step owns its own (1, 8, 128) output block -> no carried state,
    # so the grid axis is truly "parallel" (megacore sharding on v7x).
    partials = pl.pallas_call(
        kernel,
        out_shape=jax.ShapeDtypeStruct((num_tiles, 8, 128), jnp.float32),
        grid=(num_tiles,),
        in_specs=[
            pl.BlockSpec((TB, D), lambda i: (i, 0)),
            pl.BlockSpec((TB, D), lambda i: (i, 0)),
            pl.BlockSpec((TB, 1), lambda i: (i, 0)),
        ],
        out_specs=pl.BlockSpec((1, 8, 128), lambda i: (i, 0, 0)),
        compiler_params=pltpu.CompilerParams(
            dimension_semantics=("parallel",),
            vmem_limit_bytes=32 * 1024 * 1024,
        ),
    )(emb1, emb2, lbl2d)

    # Sum of per-tile partials (XLA pairwise-reduces), then fold 0.5 and 1/B.
    return partials[:, 0, 0].sum() * (0.5 / float(B))
    # TODO(synk): if tiles ever end up both small AND numerous (not reachable with the
    # current byte-capped sizing), add pipeline_mode=pl.Buffered(3) on the embedding specs.


def contrastive_loss_ref(emb1, emb2, label):
    # Pure-JAX reference mirroring the PyTorch forward.
    diff = emb1.astype(jnp.float32) - emb2.astype(jnp.float32) + _EPS
    d = jnp.sqrt(jnp.sum(diff * diff, axis=-1))
    hinge = jnp.maximum(MARGIN - d, 0.0)
    loss = 0.5 * (label.astype(jnp.float32) * 1.0 * d**2
                  + (1.0 - label.astype(jnp.float32)) * 2.0 * hinge**2)
    return loss.mean()


if __name__ == "__main__":
    key = jax.random.PRNGKey(0)
    k1, k2, k3, k4, k5, k6, k7, k8, k9 = jax.random.split(key, 9)

    # Small shapes consistent with the module: B pairs of D-dim embeddings.
    B, D = 8, 32
    emb1 = jax.random.normal(k1, (B, D), dtype=jnp.float32)
    emb2 = jax.random.normal(k2, (B, D), dtype=jnp.float32)
    label = jax.random.bernoulli(k3, 0.5, (B,)).astype(jnp.float32)

    out = contrastive_loss(emb1, emb2, label)
    jax.block_until_ready(out)
    ref = contrastive_loss_ref(emb1, emb2, label)
    assert jnp.allclose(out, ref, atol=1e-5, rtol=1e-5), (out, ref)

    # Larger shape exercising a multi-tile parallel grid and the ragged last tile.
    B2, D2 = 8192, 128
    e1 = jax.random.normal(k4, (B2, D2), dtype=jnp.float32)
    e2 = jax.random.normal(k5, (B2, D2), dtype=jnp.float32)
    lb = jax.random.bernoulli(k6, 0.5, (B2,)).astype(jnp.float32)

    out2 = contrastive_loss(e1, e2, lb)
    jax.block_until_ready(out2)
    ref2 = contrastive_loss_ref(e1, e2, lb)
    assert jnp.allclose(out2, ref2, atol=1e-3, rtol=1e-4), (out2, ref2)

    # Narrow-dtype path: bf16 embeddings stay bf16 through the DMA, widened in-kernel.
    B3, D3 = 64, 128
    e1b = jax.random.normal(k7, (B3, D3), dtype=jnp.bfloat16)
    e2b = jax.random.normal(k8, (B3, D3), dtype=jnp.bfloat16)
    lbb = jax.random.bernoulli(k9, 0.5, (B3,)).astype(jnp.float32)

    out3 = contrastive_loss(e1b, e2b, lbb)
    jax.block_until_ready(out3)
    ref3 = contrastive_loss_ref(e1b, e2b, lbb)
    assert jnp.allclose(out3, ref3, atol=1e-3, rtol=1e-3), (out3, ref3)

    print("KERNEL_OK")
</pallas_src>

<mosaic_0001>
module attributes {stable_mosaic.version = 11 : i64} {
  func.func @kernel(%arg0: i32, %arg1: memref<8x32xf32, #tpu.memory_space<vmem>>, %arg2: memref<8x32xf32, #tpu.memory_space<vmem>>, %arg3: memref<8x1xf32, #tpu.memory_space<vmem>>, %arg4: memref<1x8x128xf32, #tpu.memory_space<vmem>>) attributes {dimension_semantics = [#tpu.dimension_semantics<parallel>], iteration_bounds = array<i64: 1>, scalar_prefetch = 0 : i64, scratch_operands = 0 : i64, tpu.core_type = #tpu.core_type<tc>, window_params = [{transform_indices = @transform_0, window_bounds = array<i64: 8, 32>}, {transform_indices = @transform_1, window_bounds = array<i64: 8, 32>}, {transform_indices = @transform_2, window_bounds = array<i64: 8, 1>}, {transform_indices = @transform_3, window_bounds = array<i64: 1, 8, 128>}]} {
    %c0 = arith.constant 0 : index
    %c0_0 = arith.constant 0 : index
    %0 = vector.load %arg1[%c0, %c0_0] : memref<8x32xf32, #tpu.memory_space<vmem>>, vector<8x32xf32>
    %c0_1 = arith.constant 0 : index
    %c0_2 = arith.constant 0 : index
    %1 = vector.load %arg2[%c0_1, %c0_2] : memref<8x32xf32, #tpu.memory_space<vmem>>, vector<8x32xf32>
    %c0_3 = arith.constant 0 : index
    %c0_4 = arith.constant 0 : index
    %2 = vector.load %arg3[%c0_3, %c0_4] : memref<8x1xf32, #tpu.memory_space<vmem>>, vector<8x1xf32>
    %3 = arith.subf %0, %1 : vector<8x32xf32>
    %cst = arith.constant 9.99999997E-7 : f32
    %4 = vector.broadcast %cst : f32 to vector<8x32xf32>
    %5 = arith.addf %3, %4 : vector<8x32xf32>
    %6 = arith.mulf %5, %5 : vector<8x32xf32>
    %cst_5 = arith.constant dense<0.000000e+00> : vector<8xf32>
    %7 = vector.multi_reduction <add>, %6, %cst_5 [1] : vector<8x32xf32> to vector<8xf32>
    %8 = vector.shape_cast %7 : vector<8xf32> to vector<8x1xf32>
    %9 = math.sqrt %8 : vector<8x1xf32>
    %cst_6 = arith.constant 1.700000e+00 : f32
    %10 = vector.broadcast %cst_6 : f32 to vector<8x1xf32>
    %11 = arith.subf %10, %9 : vector<8x1xf32>
    %cst_7 = arith.constant 0.000000e+00 : f32
    %12 = vector.broadcast %cst_7 : f32 to vector<8x1xf32>
    %13 = arith.maximumf %11, %12 : vector<8x1xf32>
    %14 = arith.mulf %2, %8 : vector<8x1xf32>
    %cst_8 = arith.constant 1.000000e+00 : f32
    %15 = vector.broadcast %cst_8 : f32 to vector<8x1xf32>
    %16 = arith.subf %15, %2 : vector<8x1xf32>
    %cst_9 = arith.constant 2.000000e+00 : f32
    %17 = vector.broadcast %cst_9 : f32 to vector<8x1xf32>
    %18 = arith.mulf %17, %16 : vector<8x1xf32>
    %19 = arith.mulf %13, %13 : vector<8x1xf32>
    %20 = arith.mulf %18, %19 : vector<8x1xf32>
    %21 = arith.addf %14, %20 : vector<8x1xf32>
    %22 = vector.shape_cast %21 : vector<8x1xf32> to vector<1x8x1xf32>
    %cst_10 = arith.constant dense<0.000000e+00> : vector<1xf32>
    %23 = vector.multi_reduction <add>, %22, %cst_10 [1, 2] : vector<1x8x1xf32> to vector<1xf32>
    %24 = vector.shape_cast %23 : vector<1xf32> to vector<1x1x1xf32>
    %25 = vector.extract %24[0, 0, 0] : f32 from vector<1x1x1xf32>
    %26 = vector.broadcast %25 : f32 to vector<1x8x128xf32>
    %c0_11 = arith.constant 0 : index
    %c0_12 = arith.constant 0 : index
    %c0_13 = arith.constant 0 : index
    %27 = vector.load %arg4[%c0_11, %c0_12, %c0_13] : memref<1x8x128xf32, #tpu.memory_space<vmem>>, vector<1x8x128xf32>
    tpu.vector_store %arg4[%c0_11, %c0_12, %c0_13], %26 {strides = array<i32>} : memref<1x8x128xf32, #tpu.memory_space<vmem>>, vector<1x8x128xf32>,
    return
  }
  func.func @transform_0(%arg0: i32) -> (i32, i32) {
    %c0_i32 = arith.constant 0 : i32
    %c0_i32_0 = arith.constant 0 : i32
    return %arg0, %c0_i32 : i32, i32
  }
  func.func @transform_1(%arg0: i32) -> (i32, i32) {
    %c0_i32 = arith.constant 0 : i32
    %c0_i32_0 = arith.constant 0 : i32
    return %arg0, %c0_i32 : i32, i32
  }
  func.func @transform_2(%arg0: i32) -> (i32, i32) {
    %c0_i32 = arith.constant 0 : i32
    %c0_i32_0 = arith.constant 0 : i32
    return %arg0, %c0_i32 : i32, i32
  }
  func.func @transform_3(%arg0: i32) -> (i32, i32, i32) {
    %c0_i32 = arith.constant 0 : i32
    %c0_i32_0 = arith.constant 0 : i32
    %c0_i32_1 = arith.constant 0 : i32
    return %arg0, %c0_i32, %c0_i32_0 : i32, i32, i32
  }
}

</mosaic_0001>

<bundles_post_ra>
// kernel: tpu_custom_call.1
= control target key start
LH: loop header
LB: loop body
LE: loop exit
PB: predicated region body
PF: predicated region fallthrough
CT: control target
= control target key end

     0   :  { %8 = vsyncpa [#allocation3], 0  ;;  %s181_s0 = inlined_call_operand.vmem [shape: f32[8,32], index: 0, kind: input, shape index: {}]   ;;  %s182_s1 = inlined_call_operand.hbm [shape: f32[8,32], index: 1, kind: input, shape index: {}]   ;;  %s183_s2 = inlined_call_operand.vmem [shape: f32[8,1], index: 2, kind: input, shape index: {}]   ;;  %s184_s3 = inlined_call_operand.hbm [shape: f32[1,8,128], index: 3, kind: output, shape index: {}]  }
   0x1   :  { %9 = vsyncpa [#allocation4], 0  ;;  %s17_s14 = sshll.u32 %s182_s1, 4  ;;  %s147_s15 = smov [#allocation2]   ;;  %s18_s14 = int_to_ptr.hbm [resolvable:$true] %s17_s14 }
   0x2   :  { %s19_s16 = sshll.u32 %s147_s15, 4  ;;  %s20_s16 = int_to_ptr.vmem [resolvable:$true] %s19_s16 }
   0x3   :  { %22 = dma.hbm_to_vmem [thread:$0]  %s18_s14, 128, %s20_s16, [#allocation3]  }
   0x4   :  { %143 = dma.done.wait [#allocation3], 128  }
   0x5   :  { %144 = vsyncadd [#allocation3], 4294967168  ;;  %v29_v0 = vld [vmem:[%s181_s0] sm:$0xff]  ;;  %vm35_vm0 = vcmask 261120   ;;  %vm59_vm3 = vcmask 7168   ;;  %s148_s0 = smov [#allocation5]  }
   0x6   :  { %v30_v1 = vld [vmem:[#allocation2] sm:$0xff]  ;;  %s79_s22 = sshll.u32 %s184_s3, 4  ;;  %s80_s22 = int_to_ptr.hbm [resolvable:$true] %s79_s22 }
   0x7   :  { %v32_v2 = vsub.f32 %v29_v0, %v30_v1  ;;  %v31_v14 = vld [vmem:[%s183_s2] sm:$0xff]  ;;  %s77_s2 = sshll.u32 %s148_s0, 4  ;;  %s78_s2 = int_to_ptr.vmem [resolvable:$true] %s77_s2 }
   0x8   :  { %v54_v17 = vsub.f32 1.0, %v31_v14 }
   0x9   :  { %v33_v3 = vadd.f32 1e-06, %v32_v2 }
   0xa   :  { %v55_v21 = vmul.f32 2.0, %v54_v17 }
   0xb   :  { %v34_v4 = vmul.f32 %v33_v3, %v33_v3 }
   0xd   :  { %v36_v5 = vsel %vm35_vm0, %v34_v4, 0.0 }
   0xe   :  { %37 = vadd.xlane.f32.xlu0 %v36_v5 }
  0x81   :  { %v38_v6 = vpop.xlane.xlu0 %37 }
  0x82   :  { %93 = vrsqrt.f32 %v38_v6  ;;  %vm46_vm1 = vcmp.eq.f32.partialorder %v38_v6, inf  ;;  %v49_v15 = vand.u32 2147483648, %v38_v6  ;;  %vm48_vm2 = vcmp.eq.f32.partialorder %v38_v6, 0.0 }
  0x83   :  { %v53_v23 = vmul.f32 %v38_v6, %v31_v14 }
  0x88   :  { %v94_v7 = vpop.eup %93 }
  0x89   :  { %v40_v8 = vmul.f32 %v94_v7, %v38_v6 }
  0x8b   :  { %v41_v9 = vmul.f32 %v94_v7, %v40_v8 }
  0x8d   :  { %v42_v10 = vmul.f32 0.5, %v41_v9 }
  0x8f   :  { %v43_v11 = vsub.f32 1.5, %v42_v10 }
  0x91   :  { %v44_v12 = vmul.f32 %v94_v7, %v43_v11 }
  0x93   :  { %v45_v13 = vmul.f32 %v44_v12, %v38_v6 }
  0x95   :  { %v47_v16 = vsel %vm46_vm1, %v38_v6, %v45_v13 }
  0x96   :  { %v50_v18 = vsel %vm48_vm2, %v49_v15, %v47_v16 }
  0x97   :  { %v51_v19 = vsub.f32 1.7, %v50_v18 }
  0x99   :  { %v52_v20 = vmax.f32 %v51_v19, 0.0 }
  0x9b   :  { %v56_v22 = vmul.f32 %v52_v20, %v52_v20 }
  0x9d   :  { %v57_v24 = vmul.f32 %v56_v22, %v55_v21 }
  0x9f   :  { %v58_v25 = vadd.f32 %v57_v24, %v53_v23 }
  0xa1   :  { %v60_v26 = vsel %vm59_vm3, %v58_v25, 0.0 }
  0xa2   :  { %61 = vadd.xlane.f32.xlu0 %v60_v26 }
 0x115   :  { %v62_v27 = vpop.xlane.xlu0 %61 }
 0x116   :  { %v63_v28 = vrot.slane %v62_v27, 4 }
 0x118   :  { %v64_v29 = vadd.f32 %v63_v28, %v62_v27 }
 0x11a   :  { %v65_v30 = vrot.slane %v64_v29, 2 }
 0x11c   :  { %v66_v31 = vadd.f32 %v65_v30, %v64_v29 }
 0x11e   :  { %v67_v32 = vrot.slane %v66_v31, 1 }
 0x120   :  { %v68_v33 = vadd.f32 %v67_v32, %v66_v31 }
 0x122   :  { %89 = vpush %v68_v33 }
 0x153   :  { %s90_s23 = spop %89 }
 0x154   :  { %v70_v34 = vstv %s90_s23 }
 0x155   :  { %71 = vst [vmem:[#allocation5] sm:$0xff] %v70_v34 }
 0x156   :  { %82 = dma.vmem_to_hbm [thread:$0]  %s78_s2, 128, %s80_s22, [#allocation4]  }
 0x157   :  { %145 = dma.done.wait [#allocation4], 128  }
 0x158   :  { %146 = vsyncadd [#allocation4], 4294967168 }
 0x159   :  { %87 = vsyncpa [#allocation3], 1 }
 0x15a   :  { %88 = vsyncpa [#allocation4], 1 }

</bundles_post_ra>
